<compile_context>
chip_gen: v6e
topology: v6e:2x2x1
jax: 0.10.0
libtpu: 0.0.40
codegen_flags: <defaults>
</compile_context>

<pallas_src>
import math

import jax
import jax.numpy as jnp
from jax.experimental import pallas as pl
from jax.experimental.pallas import tpu as pltpu

# ----------------------------- model config ---------------------------------
B = 2          # batch
S = 8          # sequence length (prefill window)
H = 32         # hidden size
NH = 4         # num attention heads
HD = H // NH   # head dim (even, for RoPE)
I = 64         # MLP intermediate size
EPS = 1e-5
NEG_INF = -1e9


def _layernorm(x, w, b):
    # Two independent cross-lane reductions (sum, sum-of-squares); f32 math.
    mean = jnp.mean(x, axis=-1, keepdims=True)
    msq = jnp.mean(x * x, axis=-1, keepdims=True)
    var = msq - mean * mean
    return (x - mean) * jax.lax.rsqrt(var + EPS) * w + b


def decoder_layer_kernel(
    hs_ref,        # (1, S, H) f32  current sequence's hidden states
    cos_ref,       # (S, H)    f32  RoPE cos, pre-tiled across heads
    sin_ref,       # (S, H)    f32
    ln1_w_ref, ln1_b_ref,      # (1, H) f32
    w_qkv_ref,     # (H, 5H)  bf16  [Wq*scale | Wk | Wv | Wq@R*scale | Wk@R]
    wo_ref,        # (H, H)   bf16
    ln2_w_ref, ln2_b_ref,      # (1, H) f32
    w_gu_ref,      # (H, 2I)  bf16  [Wg | Wu]
    wd_ref,        # (I, H)   bf16
    out_ref,       # (1, S, H) f32
):
    x = hs_ref[0]                        # (S, H)
    residual = x

    # ---------------- pre-attention LayerNorm ----------------
    xn = _layernorm(x, ln1_w_ref[...], ln1_b_ref[...])

    # ---------------- fused QKV projection + elementwise RoPE -------------
    qkv = jnp.dot(xn.astype(jnp.bfloat16), w_qkv_ref[...],
                  preferred_element_type=jnp.float32)         # (S, 5H) f32
    cos = cos_ref[...]
    sin = sin_ref[...]
    # 1/sqrt(HD) is baked into the Wq / Wq@R columns at fusion time.
    q = qkv[:, 0 * H:1 * H] * cos + qkv[:, 3 * H:4 * H] * sin
    k = qkv[:, 1 * H:2 * H] * cos + qkv[:, 4 * H:5 * H] * sin
    v = qkv[:, 2 * H:3 * H]

    # ---------------- head-batched attention -------------------------------
    qh = jnp.stack([q[:, h * HD:(h + 1) * HD] for h in range(NH)], axis=0)
    kh = jnp.stack([k[:, h * HD:(h + 1) * HD] for h in range(NH)], axis=0)
    vh = jnp.stack([v[:, h * HD:(h + 1) * HD] for h in range(NH)], axis=0)

    # Causal prefill mask built in-kernel (no DMA'd mask operand).
    row = jax.lax.broadcasted_iota(jnp.int32, (S, S), 0)
    col = jax.lax.broadcasted_iota(jnp.int32, (S, S), 1)
    mask = jnp.where(col <= row, 0.0, NEG_INF)                 # (S, S) f32

    s = jnp.einsum("hqd,hkd->hqk",
                   qh.astype(jnp.bfloat16), kh.astype(jnp.bfloat16),
                   preferred_element_type=jnp.float32)         # (NH, S, S) f32
    s = s + mask[None, :, :]
    s = s - jnp.max(s, axis=-1, keepdims=True)
    p = jnp.exp(s)
    p = p * pl.reciprocal(jnp.sum(p, axis=-1, keepdims=True), approx=True)
    o = jnp.einsum("hqk,hkd->hqd",
                   p.astype(jnp.bfloat16), vh.astype(jnp.bfloat16),
                   preferred_element_type=jnp.float32)         # (NH, S, HD)
    attn = jnp.concatenate([o[h] for h in range(NH)], axis=-1)  # (S, H)
    attn = jnp.dot(attn.astype(jnp.bfloat16), wo_ref[...],
                   preferred_element_type=jnp.float32)

    x = residual + attn

    # ---------------- post-attention LayerNorm + gated MLP -----------------
    residual = x
    xn = _layernorm(x, ln2_w_ref[...], ln2_b_ref[...])
    gu = jnp.dot(xn.astype(jnp.bfloat16), w_gu_ref[...],
                 preferred_element_type=jnp.float32)           # (S, 2I)
    gate = gu[:, :I]
    up = gu[:, I:]
    act = (gate * jax.nn.sigmoid(gate) * up).astype(jnp.bfloat16)
    mlp = jnp.dot(act, wd_ref[...], preferred_element_type=jnp.float32)

    out_ref[0] = residual + mlp


# ------------------------ one-time parameter fusion -------------------------
def _rotate_half_weight(w):
    """Return w @ R where R is the rotate_half signed permutation (exact)."""
    wr = w.reshape(H, NH, HD)
    half = HD // 2
    wr = jnp.concatenate([-wr[:, :, half:], wr[:, :, :half]], axis=-1)
    return wr.reshape(H, H)


def fuse_params(params, cos, sin):
    """Init-time weight fusion / bf16 cast / RoPE-table tiling (runs ONCE)."""
    scale = 1.0 / math.sqrt(HD)
    w_qkv = jnp.concatenate(
        [params["wq"] * scale, params["wk"], params["wv"],
         _rotate_half_weight(params["wq"]) * scale,
         _rotate_half_weight(params["wk"])],
        axis=1).astype(jnp.bfloat16)                     # (H, 5H)
    w_gu = jnp.concatenate([params["wg"], params["wu"]],
                           axis=1).astype(jnp.bfloat16)  # (H, 2I)
    fused = {
        "w_qkv": w_qkv,
        "wo": params["wo"].astype(jnp.bfloat16),
        "w_gu": w_gu,
        "wd": params["wd"].astype(jnp.bfloat16),
        "ln1_w": params["ln1_w"], "ln1_b": params["ln1_b"],
        "ln2_w": params["ln2_w"], "ln2_b": params["ln2_b"],
        "cos": jnp.tile(cos, (1, NH)).astype(jnp.float32),   # (S, H)
        "sin": jnp.tile(sin, (1, NH)).astype(jnp.float32),
    }
    return jax.tree_util.tree_map(jax.block_until_ready, fused)


# ------------------------------ per-call wrapper -----------------------------
@jax.jit
def decoder_only_layer(hidden_states, fused):
    """hidden_states: (B, S, H) f32; fused: output of fuse_params (cached)."""
    return pl.pallas_call(
        decoder_layer_kernel,
        out_shape=jax.ShapeDtypeStruct((B, S, H), jnp.float32),
        grid=(B,),
        in_specs=[
            pl.BlockSpec((1, S, H), lambda b: (b, 0, 0)),   # hidden_states
            pl.BlockSpec((S, H), lambda b: (0, 0)),          # cos
            pl.BlockSpec((S, H), lambda b: (0, 0)),          # sin
            pl.BlockSpec((1, H), lambda b: (0, 0)),          # ln1_w
            pl.BlockSpec((1, H), lambda b: (0, 0)),          # ln1_b
            pl.BlockSpec((H, 5 * H), lambda b: (0, 0)),      # w_qkv
            pl.BlockSpec((H, H), lambda b: (0, 0)),          # wo
            pl.BlockSpec((1, H), lambda b: (0, 0)),          # ln2_w
            pl.BlockSpec((1, H), lambda b: (0, 0)),          # ln2_b
            pl.BlockSpec((H, 2 * I), lambda b: (0, 0)),      # w_gu
            pl.BlockSpec((I, H), lambda b: (0, 0)),          # wd
        ],
        out_specs=pl.BlockSpec((1, S, H), lambda b: (b, 0, 0)),
        compiler_params=pltpu.CompilerParams(
            dimension_semantics=("parallel",)),
    )(
        hidden_states, fused["cos"], fused["sin"],
        fused["ln1_w"], fused["ln1_b"],
        fused["w_qkv"], fused["wo"],
        fused["ln2_w"], fused["ln2_b"],
        fused["w_gu"], fused["wd"],
    )


# --------------------------------- setup ------------------------------------
def make_params(key):
    ks = jax.random.split(key, 7)
    scale = 0.05
    return {
        "ln1_w": jnp.ones((1, H), jnp.float32),
        "ln1_b": jnp.zeros((1, H), jnp.float32),
        "wq": scale * jax.random.normal(ks[0], (H, H), jnp.float32),
        "wk": scale * jax.random.normal(ks[1], (H, H), jnp.float32),
        "wv": scale * jax.random.normal(ks[2], (H, H), jnp.float32),
        "wo": scale * jax.random.normal(ks[3], (H, H), jnp.float32),
        "ln2_w": jnp.ones((1, H), jnp.float32),
        "ln2_b": jnp.zeros((1, H), jnp.float32),
        "wg": scale * jax.random.normal(ks[4], (H, I), jnp.float32),
        "wu": scale * jax.random.normal(ks[5], (H, I), jnp.float32),
        "wd": scale * jax.random.normal(ks[6], (I, H), jnp.float32),
    }


def rope_tables(seq_len, head_dim):
    inv_freq = 1.0 / (10000.0 ** (jnp.arange(0, head_dim, 2, dtype=jnp.float32) / head_dim))
    t = jnp.arange(seq_len, dtype=jnp.float32)
    freqs = jnp.outer(t, inv_freq)               # (S, HD//2)
    emb = jnp.concatenate([freqs, freqs], axis=-1)
    return jnp.cos(emb), jnp.sin(emb)


if __name__ == "__main__":
    key = jax.random.PRNGKey(0)
    k_x, k_p = jax.random.split(key)

    hidden_states = jax.random.normal(k_x, (B, S, H), jnp.float32)
    cos, sin = rope_tables(S, HD)
    params = make_params(k_p)

    # One-time init: weight fusion / bf16 cast / cos-sin tiling (cached).
    fused = fuse_params(params, cos, sin)

    out = decoder_only_layer(hidden_states, fused)
    out = jax.block_until_ready(out)
    assert out.shape == (B, S, H) and out.dtype == jnp.float32
    assert bool(jnp.all(jnp.isfinite(out)))
    print("KERNEL_OK")
</pallas_src>

<mosaic_0001>
module attributes {stable_mosaic.version = 11 : i64} {
  func.func @decoder_layer_kernel(%arg0: i32, %arg1: memref<1x8x32xf32, #tpu.memory_space<vmem>>, %arg2: memref<8x32xf32, #tpu.memory_space<vmem>>, %arg3: memref<8x32xf32, #tpu.memory_space<vmem>>, %arg4: memref<1x32xf32, #tpu.memory_space<vmem>>, %arg5: memref<1x32xf32, #tpu.memory_space<vmem>>, %arg6: memref<32x160xbf16, #tpu.memory_space<vmem>>, %arg7: memref<32x32xbf16, #tpu.memory_space<vmem>>, %arg8: memref<1x32xf32, #tpu.memory_space<vmem>>, %arg9: memref<1x32xf32, #tpu.memory_space<vmem>>, %arg10: memref<32x128xbf16, #tpu.memory_space<vmem>>, %arg11: memref<64x32xbf16, #tpu.memory_space<vmem>>, %arg12: memref<1x8x32xf32, #tpu.memory_space<vmem>>) attributes {dimension_semantics = [#tpu.dimension_semantics<parallel>], iteration_bounds = array<i64: 2>, scalar_prefetch = 0 : i64, scratch_operands = 0 : i64, tpu.core_type = #tpu.core_type<tc>, window_params = [{transform_indices = @transform_0, window_bounds = array<i64: 1, 8, 32>}, {pipeline_mode = #tpu.pipeline_mode<synchronous>, transform_indices = @transform_1, window_bounds = array<i64: 8, 32>}, {pipeline_mode = #tpu.pipeline_mode<synchronous>, transform_indices = @transform_2, window_bounds = array<i64: 8, 32>}, {pipeline_mode = #tpu.pipeline_mode<synchronous>, transform_indices = @transform_3, window_bounds = array<i64: 1, 32>}, {pipeline_mode = #tpu.pipeline_mode<synchronous>, transform_indices = @transform_4, window_bounds = array<i64: 1, 32>}, {pipeline_mode = #tpu.pipeline_mode<synchronous>, transform_indices = @transform_5, window_bounds = array<i64: 32, 160>}, {pipeline_mode = #tpu.pipeline_mode<synchronous>, transform_indices = @transform_6, window_bounds = array<i64: 32, 32>}, {pipeline_mode = #tpu.pipeline_mode<synchronous>, transform_indices = @transform_7, window_bounds = array<i64: 1, 32>}, {pipeline_mode = #tpu.pipeline_mode<synchronous>, transform_indices = @transform_8, window_bounds = array<i64: 1, 32>}, {pipeline_mode = #tpu.pipeline_mode<synchronous>, transform_indices = @transform_9, window_bounds = array<i64: 32, 128>}, {pipeline_mode = #tpu.pipeline_mode<synchronous>, transform_indices = @transform_10, window_bounds = array<i64: 64, 32>}, {transform_indices = @transform_11, window_bounds = array<i64: 1, 8, 32>}]} {
    %c0 = arith.constant 0 : index
    %c0_0 = arith.constant 0 : index
    %c0_1 = arith.constant 0 : index
    %0 = vector.load %arg1[%c0, %c0_0, %c0_1] : memref<1x8x32xf32, #tpu.memory_space<vmem>>, vector<1x8x32xf32>
    %1 = vector.shape_cast %0 : vector<1x8x32xf32> to vector<8x32xf32>
    %c0_2 = arith.constant 0 : index
    %c0_3 = arith.constant 0 : index
    %2 = vector.load %arg4[%c0_2, %c0_3] : memref<1x32xf32, #tpu.memory_space<vmem>>, vector<1x32xf32>
    %c0_4 = arith.constant 0 : index
    %c0_5 = arith.constant 0 : index
    %3 = vector.load %arg5[%c0_4, %c0_5] : memref<1x32xf32, #tpu.memory_space<vmem>>, vector<1x32xf32>
    %cst = arith.constant dense<0.000000e+00> : vector<8xf32>
    %4 = vector.multi_reduction <add>, %1, %cst [1] : vector<8x32xf32> to vector<8xf32>
    %5 = vector.shape_cast %4 : vector<8xf32> to vector<8x1xf32>
    %cst_6 = arith.constant 3.200000e+01 : f32
    %6 = vector.broadcast %cst_6 : f32 to vector<8x1xf32>
    %7 = arith.divf %5, %6 : vector<8x1xf32>
    %8 = arith.mulf %1, %1 : vector<8x32xf32>
    %cst_7 = arith.constant dense<0.000000e+00> : vector<8xf32>
    %9 = vector.multi_reduction <add>, %8, %cst_7 [1] : vector<8x32xf32> to vector<8xf32>
    %10 = vector.shape_cast %9 : vector<8xf32> to vector<8x1xf32>
    %cst_8 = arith.constant 3.200000e+01 : f32
    %11 = vector.broadcast %cst_8 : f32 to vector<8x1xf32>
    %12 = arith.divf %10, %11 : vector<8x1xf32>
    %13 = arith.mulf %7, %7 : vector<8x1xf32>
    %14 = arith.subf %12, %13 : vector<8x1xf32>
    %15 = vector.broadcast %7 : vector<8x1xf32> to vector<8x32xf32>
    %16 = arith.subf %1, %15 : vector<8x32xf32>
    %cst_9 = arith.constant 9.99999974E-6 : f32
    %17 = vector.broadcast %cst_9 : f32 to vector<8x1xf32>
    %18 = arith.addf %14, %17 : vector<8x1xf32>
    %19 = math.rsqrt %18 : vector<8x1xf32>
    %20 = vector.broadcast %19 : vector<8x1xf32> to vector<8x32xf32>
    %21 = arith.mulf %16, %20 : vector<8x32xf32>
    %22 = vector.broadcast %2 : vector<1x32xf32> to vector<8x32xf32>
    %23 = arith.mulf %21, %22 : vector<8x32xf32>
    %24 = vector.broadcast %3 : vector<1x32xf32> to vector<8x32xf32>
    %25 = arith.addf %23, %24 : vector<8x32xf32>
    %26 = arith.truncf %25 : vector<8x32xf32> to vector<8x32xbf16>
    %c0_10 = arith.constant 0 : index
    %c0_11 = arith.constant 0 : index
    %27 = vector.load %arg6[%c0_10, %c0_11] : memref<32x160xbf16, #tpu.memory_space<vmem>>, vector<32x160xbf16>
    %cst_12 = arith.constant dense<0.000000e+00> : vector<8x160xf32>
    %28 = tpu.matmul %26, %27, %cst_12 {dimension_numbers = #tpu.dot_dimension_numbers<[1], [0], [0], [1], [0, 0, 1, 1], [], []>} : vector<8x32xbf16>, vector<32x160xbf16>, vector<8x160xf32> -> vector<8x160xf32>
    %c0_13 = arith.constant 0 : index
    %c0_14 = arith.constant 0 : index
    %29 = vector.load %arg2[%c0_13, %c0_14] : memref<8x32xf32, #tpu.memory_space<vmem>>, vector<8x32xf32>
    %c0_15 = arith.constant 0 : index
    %c0_16 = arith.constant 0 : index
    %30 = vector.load %arg3[%c0_15, %c0_16] : memref<8x32xf32, #tpu.memory_space<vmem>>, vector<8x32xf32>
    %31 = vector.extract_strided_slice %28 {offsets = [0, 0], sizes = [8, 32], strides = [1, 1]} : vector<8x160xf32> to vector<8x32xf32>
    %32 = arith.mulf %31, %29 : vector<8x32xf32>
    %33 = vector.extract_strided_slice %28 {offsets = [0, 96], sizes = [8, 32], strides = [1, 1]} : vector<8x160xf32> to vector<8x32xf32>
    %34 = arith.mulf %33, %30 : vector<8x32xf32>
    %35 = arith.addf %32, %34 : vector<8x32xf32>
    %36 = vector.extract_strided_slice %28 {offsets = [0, 32], sizes = [8, 32], strides = [1, 1]} : vector<8x160xf32> to vector<8x32xf32>
    %37 = arith.mulf %36, %29 : vector<8x32xf32>
    %38 = vector.extract_strided_slice %28 {offsets = [0, 128], sizes = [8, 32], strides = [1, 1]} : vector<8x160xf32> to vector<8x32xf32>
    %39 = arith.mulf %38, %30 : vector<8x32xf32>
    %40 = arith.addf %37, %39 : vector<8x32xf32>
    %41 = vector.extract_strided_slice %28 {offsets = [0, 64], sizes = [8, 32], strides = [1, 1]} : vector<8x160xf32> to vector<8x32xf32>
    %42 = vector.extract_strided_slice %35 {offsets = [0, 0], sizes = [8, 8], strides = [1, 1]} : vector<8x32xf32> to vector<8x8xf32>
    %43 = vector.extract_strided_slice %35 {offsets = [0, 8], sizes = [8, 8], strides = [1, 1]} : vector<8x32xf32> to vector<8x8xf32>
    %44 = vector.extract_strided_slice %35 {offsets = [0, 16], sizes = [8, 8], strides = [1, 1]} : vector<8x32xf32> to vector<8x8xf32>
    %45 = vector.extract_strided_slice %35 {offsets = [0, 24], sizes = [8, 8], strides = [1, 1]} : vector<8x32xf32> to vector<8x8xf32>
    %46 = vector.shape_cast %42 : vector<8x8xf32> to vector<1x8x8xf32>
    %47 = vector.shape_cast %43 : vector<8x8xf32> to vector<1x8x8xf32>
    %48 = vector.shape_cast %44 : vector<8x8xf32> to vector<1x8x8xf32>
    %49 = vector.shape_cast %45 : vector<8x8xf32> to vector<1x8x8xf32>
    %50 = tpu.concatenate %46, %47, %48, %49 in 0 : vector<1x8x8xf32>, vector<1x8x8xf32>, vector<1x8x8xf32>, vector<1x8x8xf32> -> vector<4x8x8xf32>
    %51 = vector.extract_strided_slice %40 {offsets = [0, 0], sizes = [8, 8], strides = [1, 1]} : vector<8x32xf32> to vector<8x8xf32>
    %52 = vector.extract_strided_slice %40 {offsets = [0, 8], sizes = [8, 8], strides = [1, 1]} : vector<8x32xf32> to vector<8x8xf32>
    %53 = vector.extract_strided_slice %40 {offsets = [0, 16], sizes = [8, 8], strides = [1, 1]} : vector<8x32xf32> to vector<8x8xf32>
    %54 = vector.extract_strided_slice %40 {offsets = [0, 24], sizes = [8, 8], strides = [1, 1]} : vector<8x32xf32> to vector<8x8xf32>
    %55 = vector.shape_cast %51 : vector<8x8xf32> to vector<1x8x8xf32>
    %56 = vector.shape_cast %52 : vector<8x8xf32> to vector<1x8x8xf32>
    %57 = vector.shape_cast %53 : vector<8x8xf32> to vector<1x8x8xf32>
    %58 = vector.shape_cast %54 : vector<8x8xf32> to vector<1x8x8xf32>
    %59 = tpu.concatenate %55, %56, %57, %58 in 0 : vector<1x8x8xf32>, vector<1x8x8xf32>, vector<1x8x8xf32>, vector<1x8x8xf32> -> vector<4x8x8xf32>
    %60 = vector.extract_strided_slice %41 {offsets = [0, 0], sizes = [8, 8], strides = [1, 1]} : vector<8x32xf32> to vector<8x8xf32>
    %61 = vector.extract_strided_slice %41 {offsets = [0, 8], sizes = [8, 8], strides = [1, 1]} : vector<8x32xf32> to vector<8x8xf32>
    %62 = vector.extract_strided_slice %41 {offsets = [0, 16], sizes = [8, 8], strides = [1, 1]} : vector<8x32xf32> to vector<8x8xf32>
    %63 = vector.extract_strided_slice %41 {offsets = [0, 24], sizes = [8, 8], strides = [1, 1]} : vector<8x32xf32> to vector<8x8xf32>
    %64 = vector.shape_cast %60 : vector<8x8xf32> to vector<1x8x8xf32>
    %65 = vector.shape_cast %61 : vector<8x8xf32> to vector<1x8x8xf32>
    %66 = vector.shape_cast %62 : vector<8x8xf32> to vector<1x8x8xf32>
    %67 = vector.shape_cast %63 : vector<8x8xf32> to vector<1x8x8xf32>
    %68 = tpu.concatenate %64, %65, %66, %67 in 0 : vector<1x8x8xf32>, vector<1x8x8xf32>, vector<1x8x8xf32>, vector<1x8x8xf32> -> vector<4x8x8xf32>
    %69 = tpu.iota {dimensions = array<i32: 0>} : vector<8x8xi32>
    %70 = tpu.iota {dimensions = array<i32: 1>} : vector<8x8xi32>
    %71 = arith.cmpi sle, %70, %69 : vector<8x8xi32>
    %cst_17 = arith.constant 0.000000e+00 : f32
    %cst_18 = arith.constant -1.000000e+09 : f32
    %72 = vector.broadcast %cst_17 : f32 to vector<8x8xf32>
    %73 = vector.broadcast %cst_18 : f32 to vector<8x8xf32>
    %74 = arith.select %71, %72, %73 : vector<8x8xi1>, vector<8x8xf32>
    %75 = arith.truncf %50 : vector<4x8x8xf32> to vector<4x8x8xbf16>
    %76 = arith.truncf %59 : vector<4x8x8xf32> to vector<4x8x8xbf16>
    "tpu.trace_start"() <{level = 10 : i32, message = "hqd,hkd->hqk"}> : () -> ()
    %cst_19 = arith.constant dense<0.000000e+00> : vector<4x8x8xf32>
    %77 = tpu.matmul %75, %76, %cst_19 {dimension_numbers = #tpu.dot_dimension_numbers<[2], [2], [1], [1], [0, 0, 0, 1, 1, 1], [0], [0]>} : vector<4x8x8xbf16>, vector<4x8x8xbf16>, vector<4x8x8xf32> -> vector<4x8x8xf32>
    "tpu.trace_stop"() : () -> ()
    %78 = vector.shape_cast %74 : vector<8x8xf32> to vector<1x8x8xf32>
    %79 = vector.broadcast %78 : vector<1x8x8xf32> to vector<4x8x8xf32>
    %80 = arith.addf %77, %79 : vector<4x8x8xf32>
    %cst_20 = arith.constant dense<0xFF800000> : vector<4x8xf32>
    %81 = vector.multi_reduction <maximumf>, %80, %cst_20 [2] : vector<4x8x8xf32> to vector<4x8xf32>
    %82 = vector.shape_cast %81 : vector<4x8xf32> to vector<4x8x1xf32>
    %83 = vector.broadcast %82 : vector<4x8x1xf32> to vector<4x8x8xf32>
    %84 = arith.subf %80, %83 : vector<4x8x8xf32>
    %85 = math.exp %84 : vector<4x8x8xf32>
    %cst_21 = arith.constant dense<0.000000e+00> : vector<4x8xf32>
    %86 = vector.multi_reduction <add>, %85, %cst_21 [2] : vector<4x8x8xf32> to vector<4x8xf32>
    %87 = vector.shape_cast %86 : vector<4x8xf32> to vector<4x8x1xf32>
    %88 = tpu.reciprocal %87 {approx = true} : vector<4x8x1xf32> -> vector<4x8x1xf32>
    %89 = vector.broadcast %88 : vector<4x8x1xf32> to vector<4x8x8xf32>
    %90 = arith.mulf %85, %89 : vector<4x8x8xf32>
    %91 = arith.truncf %90 : vector<4x8x8xf32> to vector<4x8x8xbf16>
    %92 = arith.truncf %68 : vector<4x8x8xf32> to vector<4x8x8xbf16>
    "tpu.trace_start"() <{level = 10 : i32, message = "hqk,hkd->hqd"}> : () -> ()
    %cst_22 = arith.constant dense<0.000000e+00> : vector<4x8x8xf32>
    %93 = tpu.matmul %91, %92, %cst_22 {dimension_numbers = #tpu.dot_dimension_numbers<[2], [1], [1], [2], [0, 0, 0, 1, 1, 2], [0], [0]>} : vector<4x8x8xbf16>, vector<4x8x8xbf16>, vector<4x8x8xf32> -> vector<4x8x8xf32>
    "tpu.trace_stop"() : () -> ()
    %94 = vector.extract_strided_slice %93 {offsets = [0, 0, 0], sizes = [1, 8, 8], strides = [1, 1, 1]} : vector<4x8x8xf32> to vector<1x8x8xf32>
    %95 = vector.shape_cast %94 : vector<1x8x8xf32> to vector<8x8xf32>
    %96 = vector.extract_strided_slice %93 {offsets = [1, 0, 0], sizes = [1, 8, 8], strides = [1, 1, 1]} : vector<4x8x8xf32> to vector<1x8x8xf32>
    %97 = vector.shape_cast %96 : vector<1x8x8xf32> to vector<8x8xf32>
    %98 = vector.extract_strided_slice %93 {offsets = [2, 0, 0], sizes = [1, 8, 8], strides = [1, 1, 1]} : vector<4x8x8xf32> to vector<1x8x8xf32>
    %99 = vector.shape_cast %98 : vector<1x8x8xf32> to vector<8x8xf32>
    %100 = vector.extract_strided_slice %93 {offsets = [3, 0, 0], sizes = [1, 8, 8], strides = [1, 1, 1]} : vector<4x8x8xf32> to vector<1x8x8xf32>
    %101 = vector.shape_cast %100 : vector<1x8x8xf32> to vector<8x8xf32>
    %102 = tpu.concatenate %95, %97, %99, %101 in 1 : vector<8x8xf32>, vector<8x8xf32>, vector<8x8xf32>, vector<8x8xf32> -> vector<8x32xf32>
    %103 = arith.truncf %102 : vector<8x32xf32> to vector<8x32xbf16>
    %c0_23 = arith.constant 0 : index
    %c0_24 = arith.constant 0 : index
    %104 = vector.load %arg7[%c0_23, %c0_24] : memref<32x32xbf16, #tpu.memory_space<vmem>>, vector<32x32xbf16>
    %cst_25 = arith.constant dense<0.000000e+00> : vector<8x32xf32>
    %105 = tpu.matmul %103, %104, %cst_25 {dimension_numbers = #tpu.dot_dimension_numbers<[1], [0], [0], [1], [0, 0, 1, 1], [], []>} : vector<8x32xbf16>, vector<32x32xbf16>, vector<8x32xf32> -> vector<8x32xf32>
    %106 = arith.addf %1, %105 : vector<8x32xf32>
    %c0_26 = arith.constant 0 : index
    %c0_27 = arith.constant 0 : index
    %107 = vector.load %arg8[%c0_26, %c0_27] : memref<1x32xf32, #tpu.memory_space<vmem>>, vector<1x32xf32>
    %c0_28 = arith.constant 0 : index
    %c0_29 = arith.constant 0 : index
    %108 = vector.load %arg9[%c0_28, %c0_29] : memref<1x32xf32, #tpu.memory_space<vmem>>, vector<1x32xf32>
    %cst_30 = arith.constant dense<0.000000e+00> : vector<8xf32>
    %109 = vector.multi_reduction <add>, %106, %cst_30 [1] : vector<8x32xf32> to vector<8xf32>
    %110 = vector.shape_cast %109 : vector<8xf32> to vector<8x1xf32>
    %cst_31 = arith.constant 3.200000e+01 : f32
    %111 = vector.broadcast %cst_31 : f32 to vector<8x1xf32>
    %112 = arith.divf %110, %111 : vector<8x1xf32>
    %113 = arith.mulf %106, %106 : vector<8x32xf32>
    %cst_32 = arith.constant dense<0.000000e+00> : vector<8xf32>
    %114 = vector.multi_reduction <add>, %113, %cst_32 [1] : vector<8x32xf32> to vector<8xf32>
    %115 = vector.shape_cast %114 : vector<8xf32> to vector<8x1xf32>
    %cst_33 = arith.constant 3.200000e+01 : f32
    %116 = vector.broadcast %cst_33 : f32 to vector<8x1xf32>
    %117 = arith.divf %115, %116 : vector<8x1xf32>
    %118 = arith.mulf %112, %112 : vector<8x1xf32>
    %119 = arith.subf %117, %118 : vector<8x1xf32>
    %120 = vector.broadcast %112 : vector<8x1xf32> to vector<8x32xf32>
    %121 = arith.subf %106, %120 : vector<8x32xf32>
    %cst_34 = arith.constant 9.99999974E-6 : f32
    %122 = vector.broadcast %cst_34 : f32 to vector<8x1xf32>
    %123 = arith.addf %119, %122 : vector<8x1xf32>
    %124 = math.rsqrt %123 : vector<8x1xf32>
    %125 = vector.broadcast %124 : vector<8x1xf32> to vector<8x32xf32>
    %126 = arith.mulf %121, %125 : vector<8x32xf32>
    %127 = vector.broadcast %107 : vector<1x32xf32> to vector<8x32xf32>
    %128 = arith.mulf %126, %127 : vector<8x32xf32>
    %129 = vector.broadcast %108 : vector<1x32xf32> to vector<8x32xf32>
    %130 = arith.addf %128, %129 : vector<8x32xf32>
    %131 = arith.truncf %130 : vector<8x32xf32> to vector<8x32xbf16>
    %c0_35 = arith.constant 0 : index
    %c0_36 = arith.constant 0 : index
    %132 = vector.load %arg10[%c0_35, %c0_36] : memref<32x128xbf16, #tpu.memory_space<vmem>>, vector<32x128xbf16>
    %cst_37 = arith.constant dense<0.000000e+00> : vector<8x128xf32>
    %133 = tpu.matmul %131, %132, %cst_37 {dimension_numbers = #tpu.dot_dimension_numbers<[1], [0], [0], [1], [0, 0, 1, 1], [], []>} : vector<8x32xbf16>, vector<32x128xbf16>, vector<8x128xf32> -> vector<8x128xf32>
    %134 = vector.extract_strided_slice %133 {offsets = [0, 0], sizes = [8, 64], strides = [1, 1]} : vector<8x128xf32> to vector<8x64xf32>
    %135 = vector.extract_strided_slice %133 {offsets = [0, 64], sizes = [8, 64], strides = [1, 1]} : vector<8x128xf32> to vector<8x64xf32>
    %136 = arith.negf %134 : vector<8x64xf32>
    %137 = math.exp %136 : vector<8x64xf32>
    %cst_38 = arith.constant 1.000000e+00 : f32
    %138 = vector.broadcast %cst_38 : f32 to vector<8x64xf32>
    %139 = arith.addf %138, %137 : vector<8x64xf32>
    %140 = arith.divf %138, %139 : vector<8x64xf32>
    %141 = arith.mulf %134, %140 : vector<8x64xf32>
    %142 = arith.mulf %141, %135 : vector<8x64xf32>
    %143 = arith.truncf %142 : vector<8x64xf32> to vector<8x64xbf16>
    %c0_39 = arith.constant 0 : index
    %c0_40 = arith.constant 0 : index
    %144 = vector.load %arg11[%c0_39, %c0_40] : memref<64x32xbf16, #tpu.memory_space<vmem>>, vector<64x32xbf16>
    %cst_41 = arith.constant dense<0.000000e+00> : vector<8x32xf32>
    %145 = tpu.matmul %143, %144, %cst_41 {dimension_numbers = #tpu.dot_dimension_numbers<[1], [0], [0], [1], [0, 0, 1, 1], [], []>} : vector<8x64xbf16>, vector<64x32xbf16>, vector<8x32xf32> -> vector<8x32xf32>
    %146 = arith.addf %106, %145 : vector<8x32xf32>
    %c0_42 = arith.constant 0 : index
    %c0_43 = arith.constant 0 : index
    %c0_44 = arith.constant 0 : index
    %147 = vector.load %arg12[%c0_42, %c0_43, %c0_44] : memref<1x8x32xf32, #tpu.memory_space<vmem>>, vector<1x8x32xf32>
    %148 = vector.shape_cast %147 : vector<1x8x32xf32> to vector<8x32xf32>
    %149 = vector.shape_cast %146 : vector<8x32xf32> to vector<1x8x32xf32>
    tpu.vector_store %arg12[%c0_42, %c0_43, %c0_44], %149 {strides = array<i32>} : memref<1x8x32xf32, #tpu.memory_space<vmem>>, vector<1x8x32xf32>,
    return
  }
  func.func @transform_0(%arg0: i32) -> (i32, i32, i32) {
    %c0_i32 = arith.constant 0 : i32
    %c0_i32_0 = arith.constant 0 : i32
    %c0_i32_1 = arith.constant 0 : i32
    return %arg0, %c0_i32, %c0_i32_0 : i32, i32, i32
  }
  func.func @transform_1(%arg0: i32) -> (i32, i32) {
    %c0_i32 = arith.constant 0 : i32
    %c0_i32_0 = arith.constant 0 : i32
    %c0_i32_1 = arith.constant 0 : i32
    return %c0_i32, %c0_i32_0 : i32, i32
  }
  func.func @transform_2(%arg0: i32) -> (i32, i32) {
    %c0_i32 = arith.constant 0 : i32
    %c0_i32_0 = arith.constant 0 : i32
    %c0_i32_1 = arith.constant 0 : i32
    return %c0_i32, %c0_i32_0 : i32, i32
  }
  func.func @transform_3(%arg0: i32) -> (i32, i32) {
    %c0_i32 = arith.constant 0 : i32
    %c0_i32_0 = arith.constant 0 : i32
    %c0_i32_1 = arith.constant 0 : i32
    return %c0_i32, %c0_i32_0 : i32, i32
  }
  func.func @transform_4(%arg0: i32) -> (i32, i32) {
    %c0_i32 = arith.constant 0 : i32
    %c0_i32_0 = arith.constant 0 : i32
    %c0_i32_1 = arith.constant 0 : i32
    return %c0_i32, %c0_i32_0 : i32, i32
  }
  func.func @transform_5(%arg0: i32) -> (i32, i32) {
    %c0_i32 = arith.constant 0 : i32
    %c0_i32_0 = arith.constant 0 : i32
    %c0_i32_1 = arith.constant 0 : i32
    return %c0_i32, %c0_i32_0 : i32, i32
  }
  func.func @transform_6(%arg0: i32) -> (i32, i32) {
    %c0_i32 = arith.constant 0 : i32
    %c0_i32_0 = arith.constant 0 : i32
    %c0_i32_1 = arith.constant 0 : i32
    return %c0_i32, %c0_i32_0 : i32, i32
  }
  func.func @transform_7(%arg0: i32) -> (i32, i32) {
    %c0_i32 = arith.constant 0 : i32
    %c0_i32_0 = arith.constant 0 : i32
    %c0_i32_1 = arith.constant 0 : i32
    return %c0_i32, %c0_i32_0 : i32, i32
  }
  func.func @transform_8(%arg0: i32) -> (i32, i32) {
    %c0_i32 = arith.constant 0 : i32
    %c0_i32_0 = arith.constant 0 : i32
    %c0_i32_1 = arith.constant 0 : i32
    return %c0_i32, %c0_i32_0 : i32, i32
  }
  func.func @transform_9(%arg0: i32) -> (i32, i32) {
    %c0_i32 = arith.constant 0 : i32
    %c0_i32_0 = arith.constant 0 : i32
    %c0_i32_1 = arith.constant 0 : i32
    return %c0_i32, %c0_i32_0 : i32, i32
  }
  func.func @transform_10(%arg0: i32) -> (i32, i32) {
    %c0_i32 = arith.constant 0 : i32
    %c0_i32_0 = arith.constant 0 : i32
    %c0_i32_1 = arith.constant 0 : i32
    return %c0_i32, %c0_i32_0 : i32, i32
  }
  func.func @transform_11(%arg0: i32) -> (i32, i32, i32) {
    %c0_i32 = arith.constant 0 : i32
    %c0_i32_0 = arith.constant 0 : i32
    %c0_i32_1 = arith.constant 0 : i32
    return %arg0, %c0_i32, %c0_i32_0 : i32, i32, i32
  }
}

</mosaic_0001>

<bundles_post_ra>
// kernel: decoder_only_layer.1
= control target key start
LH: loop header
LB: loop body
LE: loop exit
PB: predicated region body
PF: predicated region fallthrough
CT: control target
= control target key end

     0   :  { %s2491_s0 = inlined_call_operand.vmem [shape: f32[2,8,32], index: 0, kind: input, shape index: {}]   ;;  %s2492_s1 = inlined_call_operand.hbm [shape: f32[8,32], index: 1, kind: input, shape index: {}]   ;;  %s2493_s2 = inlined_call_operand.hbm [shape: f32[8,32], index: 2, kind: input, shape index: {}]   ;;  %s2494_s3 = inlined_call_operand.hbm [shape: f32[1,32], index: 3, kind: input, shape index: {}]   ;;  %s2495_s4 = inlined_call_operand.hbm [shape: f32[1,32], index: 4, kind: input, shape index: {}]   ;;  %s2496_s5 = inlined_call_operand.vmem [shape: bf16[32,160], index: 5, kind: input, shape index: {}]   ;;  %s2497_s6 = inlined_call_operand.vmem [shape: bf16[32,32], index: 6, kind: input, shape index: {}]   ;;  %s2498_s7 = inlined_call_operand.hbm [shape: f32[1,32], index: 7, kind: input, shape index: {}]   ;;  %s2499_s8 = inlined_call_operand.hbm [shape: f32[1,32], index: 8, kind: input, shape index: {}]   ;;  %s2500_s9 = inlined_call_operand.hbm [shape: bf16[32,128], index: 9, kind: input, shape index: {}]   ;;  %s2501_s10 = inlined_call_operand.vmem [shape: bf16[64,32], index: 10, kind: input, shape index: {}]   ;;  %s2502_s11 = inlined_call_operand.hbm [shape: f32[2,8,32], index: 11, kind: output, shape index: {}]  }
   0x1   :  { %2507 = sst [smem:[#allocation22_spill]] %s2493_s2 }
   0x2   :  { %16 = vsyncpa [#allocation3], 0 }
   0x3   :  { %17 = vsyncpa [#allocation6], 0 }
   0x4   :  { %18 = vsyncpa [#allocation9], 0 }
   0x5   :  { %19 = vsyncpa [#allocation12], 0 }
   0x6   :  { %20 = vsyncpa [#allocation4], 0 }
   0x7   :  { %22 = vsyncpa [#allocation4 + $0x1], 0  ;;  %s2154_s17 = smov 0   ;;  %s2156_s18 = smov 0  }
   0x8   :  { %s2158_s19 = smov 0   ;;  %s2160_s20 = smov 0  }
   0x9 LB: > { %2508 = sst [smem:[#allocation20_spill]] %s2065_s19  ;;  %s2175_s21 = sadd.s32 4294967295, %s2069_s20   ;;  %s2069_s20 = sphi %s2160_s20, %s2531_s20   ;;  %s2065_s19 = sphi %s2158_s19, %s2528_s19   ;;  %s2061_s18 = sphi %s2156_s18, %s2530_s18   ;;  %s2057_s17 = sphi %s2154_s17, %s2529_s17  }
   0xa   : > { %s1492_s22 = sadd.s32 4294967294, %s2069_s20   ;;  %s2179_s23 = sadd.s32 1, %s2069_s20  }
   0xb   : > { %s271_s24 = sadd.s32 1, %s2065_s19  ;;  %s268_s25 = ssub.s32 %s2069_s20, %s2179_s23 }
   0xc   : > { %p281_p0 = scmp.ne.s32.totalorder %s2065_s19, %s2061_s18  ;;  %p269_p1 = scmp.eq.s32.totalorder %s268_s25, 0 }
   0xd   : > { %p282_p2 = scmp.eq.s32.totalorder %s2175_s21, 1  ;;  %p287_p3 = scmp.ne.s32.totalorder %s2061_s18, %s2057_s17 }
   0xe   : > { %p288_p4 = scmp.eq.s32.totalorder %s1492_s22, 1  ;;  %p1493_p7 = scmp.ge.s32.totalorder %s2069_s20, 1 }
   0xf   : > { %s2190_s26 = scalar_select %p269_p1, %s2065_s19, %s271_s24  }
  0x10   : > { %p2192_p5 = por %p282_p2, %p281_p0  ;;  %p2196_p6 = por %p288_p4, %p287_p3 }
  0x11   : > { %2509 = sst [smem:[#allocation21_spill]] %s2190_s26  ;;  %p295_p8 = scmp.lt.s32.totalorder %s2069_s20, 3 }
  0x12   : > { %s2510_s27 = scalar_select %p2192_p5, 1, 0 }
  0x13   : > { %s2511_s28 = scalar_select %p2196_p6, 1, 0 }
  0x14   : > { %p2503_p9 = scmp.eq.s32.totalorder %s2175_s21, 0  ;;  %p2203_p10 = pnand %p1493_p7, %p295_p8 }
  0x15   : > { %s2071_s30 = smov [#allocation5]   ;;  %s2072_s13 = smov [#allocation8]  }
  0x16   : > { %s2512_s29 = scalar_select %p2203_p10, 1, 0 }
  0x17   : > { %s319_s12 = sshll.u32 %s2071_s30, 4  ;;  %p1678_p11 = pneg %p2203_p10  ;;  %s320_s12 = int_to_ptr.vmem [resolvable:$true] %s319_s12 }
  0x18   : > { %s341_s14 = sshll.u32 %s2072_s13, 4  ;;  %s2073_s16 = smov [#allocation11]   ;;  %s342_s14 = int_to_ptr.vmem [resolvable:$true] %s341_s14 }
  0x19   : > { %p2211_p12 = pnand %p2503_p9, %p1678_p11  ;;  %s369_s22 = sshll.u32 %s2073_s16, 4  ;;  %s2215_s22 = int_to_ptr.vmem [resolvable:$true] %s369_s22 }
  0x1a   : > { %s1822_s25 = scalar_lea.vmem %s320_s12, 128  ;;  %p1830_p3 = scmp.lt.s32.totalorder %s320_s12, %s320_s12 }
  0x1b   : > { %p2219_p13 = pneg %p2211_p12  ;;  %p1823_p0 = scmp.ne.s32.totalorder %s320_s12, %s1822_s25 }
  0x1c   : > { %p1831_p4 = scmp.lt.s32.totalorder %s1822_s25, %s1822_s25 }
  0x1d   : > { %p1825_p1 = pnand %p1823_p0, %p2219_p13 }
  0x1e   : > { %p1832_p7 = por %p1831_p4, %p1830_p3 }
  0x1f   : > { %p1826_p2 = pneg %p1825_p1 }
  0x21   : > { %p1833_p8 = pnand %p1832_p7, %p1826_p2 }
  0x23   : > { %1836 = shalt.err (!%p1833_p8)
}
  0x24   : > { %s2515_s2 = sld [smem:[#allocation22_spill]]  ;;  %s1848_s16 = scalar_lea.vmem %s342_s14, 16 }
  0x25   : > { %p1849_p11 = scmp.ne.s32.totalorder %s342_s14, %s1848_s16  ;;  %s1855_s26 = scalar_lea.vmem %s342_s14, 32 }
  0x26   : > { %p1856_p0 = scmp.lt.s32.totalorder %s342_s14, %s342_s14  ;;  %p1857_p1 = scmp.lt.s32.totalorder %s1855_s26, %s1848_s16 }
  0x27   : > { %p1851_p9 = pnand %p1849_p11, %p2219_p13 }
  0x28   : > { %p1858_p5 = por %p1857_p1, %p1856_p0 }
  0x29   : > { %p1852_p6 = pneg %p1851_p9 }
  0x2a   : > { %1684 = dma.hbm_to_vmem [thread:$0]  (!%p2211_p12), %s2515_s2, 128, %s320_s12, [#allocation6]  }
  0x2b   : > { %p1859_p10 = pnand %p1858_p5, %p1852_p6 }
  0x2d   : > { %1862 = shalt.err (!%p1859_p10)
}
  0x2e   : > { %1690 = dma.hbm_to_vmem [thread:$0]  (!%p2211_p12), %s2495_s4, 16, %s342_s14, [#allocation9]  }
  0x2f   : > { %s1874_s12 = scalar_lea.vmem %s2215_s22, 16  ;;  %s1881_s26 = scalar_lea.vmem %s2215_s22, 32 }
  0x30   : > { %p1875_p2 = scmp.ne.s32.totalorder %s2215_s22, %s1874_s12  ;;  %p1882_p5 = scmp.lt.s32.totalorder %s2215_s22, %s2215_s22 }
  0x31   : > { %p1883_p6 = scmp.lt.s32.totalorder %s1881_s26, %s1874_s12 }
  0x32   : > { %p1877_p9 = pnand %p1875_p2, %p2219_p13 }
  0x33   : > { %p1884_p10 = por %p1883_p6, %p1882_p5 }
  0x34   : > { %p1878_p3 = pneg %p1877_p9 }
  0x36   : > { %p1885_p4 = pnand %p1884_p10, %p1878_p3 }
  0x38   : > { %1888 = shalt.err (!%p1885_p4)
}
  0x39   : > { %1696 = dma.hbm_to_vmem [thread:$0]  (!%p2211_p12), %s2499_s8, 16, %s2215_s22, [#allocation12]  }
  0x3a   : > { %s2074_s14 = smov [#allocation2]   ;;  %s2075_s16 = smov [#allocation7]  }
  0x3b   : > { %s308_s13 = sshll.u32 %s2074_s14, 4  ;;  %s330_s25 = sshll.u32 %s2075_s16, 4  ;;  %s309_s13 = int_to_ptr.vmem [resolvable:$true] %s308_s13  ;;  %s331_s25 = int_to_ptr.vmem [resolvable:$true] %s330_s25 }
  0x3c   : > { %s1900_s2 = scalar_lea.vmem %s309_s13, 128  ;;  %p1908_p0 = scmp.lt.s32.totalorder %s309_s13, %s309_s13 }
  0x3d   : > { %p1901_p7 = scmp.ne.s32.totalorder %s309_s13, %s1900_s2  ;;  %p1909_p1 = scmp.lt.s32.totalorder %s1900_s2, %s1900_s2 }
  0x3f   : > { %p1903_p8 = pnand %p1901_p7, %p2219_p13  ;;  %p1910_p2 = por %p1909_p1, %p1908_p0 }
  0x41   : > { %p1904_p11 = pneg %p1903_p8 }
  0x43   : > { %p1911_p9 = pnand %p1910_p2, %p1904_p11 }
  0x45   : > { %1914 = shalt.err (!%p1911_p9)
}
  0x46   : > { %1681 = dma.hbm_to_vmem [thread:$0]  (!%p2211_p12), %s2492_s1, 128, %s309_s13, [#allocation3]  }
  0x47   : > { %s1926_s22 = scalar_lea.vmem %s331_s25, 16  ;;  %s1933_s19 = scalar_lea.vmem %s331_s25, 32 }
  0x48   : > { %p1927_p3 = scmp.ne.s32.totalorder %s331_s25, %s1926_s22  ;;  %p1934_p10 = scmp.lt.s32.totalorder %s331_s25, %s331_s25 }
  0x49   : > { %p1935_p4 = scmp.lt.s32.totalorder %s1933_s19, %s1926_s22 }
  0x4a   : > { %p1929_p5 = pnand %p1927_p3, %p2219_p13 }
  0x4b   : > { %p1936_p7 = por %p1935_p4, %p1934_p10 }
  0x4c   : > { %p1930_p6 = pneg %p1929_p5 }
  0x4e   : > { %p1937_p8 = pnand %p1936_p7, %p1930_p6 }
  0x50   : > { %1940 = shalt.err (!%p1937_p8)
}
  0x51   : > { %1687 = dma.hbm_to_vmem [thread:$0]  (!%p2211_p12), %s2494_s3, 16, %s331_s25, [#allocation6]  }
  0x52   : > { %s2076_s14 = smov [#allocation10]   ;;  %s2077_s16 = smov [#allocation13]  }
  0x53   : > { %s358_s13 = sshll.u32 %s2076_s14, 4  ;;  %s379_s12 = sshll.u32 %s2077_s16, 4  ;;  %s359_s13 = int_to_ptr.vmem [resolvable:$true] %s358_s13  ;;  %s380_s12 = int_to_ptr.vmem [resolvable:$true] %s379_s12 }
  0x54   : > { %s1952_s26 = scalar_lea.vmem %s359_s13, 16  ;;  %s1959_s22 = scalar_lea.vmem %s359_s13, 32 }
  0x55   : > { %p1953_p11 = scmp.ne.s32.totalorder %s359_s13, %s1952_s26  ;;  %p1960_p2 = scmp.lt.s32.totalorder %s359_s13, %s359_s13 }
  0x56   : > { %p1961_p9 = scmp.lt.s32.totalorder %s1959_s22, %s1952_s26 }
  0x57   : > { %p1955_p0 = pnand %p1953_p11, %p2219_p13 }
  0x58   : > { %p1962_p3 = por %p1961_p9, %p1960_p2 }
  0x59   : > { %p1956_p1 = pneg %p1955_p0 }
  0x5b   : > { %p1963_p5 = pnand %p1962_p3, %p1956_p1 }
  0x5d   : > { %1966 = shalt.err (!%p1963_p5)
}
  0x5e   : > { %1693 = dma.hbm_to_vmem [thread:$0]  (!%p2211_p12), %s2498_s7, 16, %s359_s13, [#allocation9]  }
  0x5f   : > { %s1978_s2 = scalar_lea.vmem %s380_s12, 256  ;;  %p1986_p7 = scmp.lt.s32.totalorder %s380_s12, %s380_s12 }
  0x60   : > { %p1979_p6 = scmp.ne.s32.totalorder %s380_s12, %s1978_s2  ;;  %p1987_p8 = scmp.lt.s32.totalorder %s1978_s2, %s1978_s2 }
  0x62   : > { %p1981_p10 = pnand %p1979_p6, %p2219_p13  ;;  %p1988_p11 = por %p1987_p8, %p1986_p7 }
  0x64   : > { %p1982_p4 = pneg %p1981_p10 }
  0x66   : > { %p1989_p0 = pnand %p1988_p11, %p1982_p4 }
  0x68   : > { %1992 = shalt.err (!%p1989_p0)
}
  0x69   : > { %s2078_s30 = smov 64   ;;  %s2079_s14 = smov 4  }
  0x6a   : > { %1699 = dma.hbm_to_vmem [thread:$0]  (!%p2211_p12), %s2500_s9, 256, %s380_s12, [#allocation12], %s2078_s30, %s2078_s30, %s2079_s14  }
  0x6b   : > { %p2516_p1 = scmp.ne.s32.totalorder %s2512_s29, 0 }
  0x6c   : > { %p2517_p2 = scmp.eq.s32.totalorder (!%p2516_p1), %s2175_s21, 0 }
  0x6d   : > { %405 = sbr.rel (%p2516_p1) target bundleno = 2569 (0xa09), region = 64 }
  0x72   : > { %2036 = dma.done.wait (%p2517_p2), [#allocation3], 128   ;;  %p2518_p13 = pmov %p2517_p2 }
  0x73   : > { %p2519_p9 = pmov %p2517_p2 }
  0x74   : > { %2038 = vsyncadd (%p2518_p13), [#allocation3], 4294967168 }
  0x75   : > { %2040 = dma.done.wait (%p2519_p9), [#allocation6], 144   ;;  %p2520_p3 = pmov %p2517_p2 }
  0x76   : > { %p2521_p5 = pmov %p2517_p2 }
  0x77   : > { %2042 = vsyncadd (%p2520_p3), [#allocation6], 4294967152 }
  0x78   : > { %2044 = dma.done.wait (%p2521_p5), [#allocation9], 32   ;;  %p2522_p12 = pmov %p2517_p2 }
  0x79   : > { %p2523_p6 = pmov %p2517_p2 }
  0x7a   : > { %2046 = vsyncadd (%p2522_p12), [#allocation9], 4294967264 }
  0x7b   : > { %2048 = dma.done.wait (%p2523_p6), [#allocation12], 272   ;;  %p2524_p10 = pmov %p2517_p2 }
  0x7c   : > { %p468_p4 = scmp.lt.s32.totalorder %s2175_s21, 1  ;;  %vm476_vm0 = vcmask 261120   ;;  %v1773_v4 = vld [vmem:[%s2496_s5 + $0x14] ss:$8 sps:$4 sm:$0xff]   ;;  %v1775_v5 = vld [vmem:[%s2496_s5 + $0x10] ss:$8 sps:$4 sm:$0xff]   ;;  %v630_v63 = vlaneseq }
  0x7d   : > { %2050 = vsyncadd (%p2524_p10), [#allocation12], 4294967024  ;;  %v1776_v6 = vld [vmem:[%s2496_s5 + $0x4] ss:$8 sps:$4 sm:$0xff]   ;;  %547 = vmatprep.subr.bf16.mxu0 %v1773_v4  ;;  %v2080_v7 = vmov 0   ;;  %v2083_v37 = vmov 0.0  }
  0x7e   : > { %s469_s29 = scalar_select %p468_p4, %s2175_s21, 1  ;;  %567 = vmatprep.mubr.bf16.mxu0 %v2080_v7  ;;  %548 = vmatpush1.bf16.msra.mxu0 %v1775_v5  ;;  %v1778_v8 = vld [vmem:[%s2496_s5] ss:$8 sps:$4 sm:$0xff]   ;;  %v1512_v20 = vld [vmem:[#allocation7] ss:$0 sm:$0xff]  ;;  %vm2085_vm1 = vmmov 0  }
  0x7f   : > { %549 = vmatprep.subr.bf16.mxu0 %v1776_v6  ;;  %v576_v9 = vld [vmem:[#allocation2] sm:$0xff]  ;;  %v577_v10 = vld [vmem:[#allocation5] sm:$0xff]  ;;  %v1513_v22 = vld [vmem:[#allocation8] ss:$0 sm:$0xff]  ;;  %1572 = vmatprep.subr.bf16.mxu1 %v2083_v37  ;;  %s2084_s24 = smov 120   ;;  %s2086_s13 = smov 112  }
  0x80   : > { %s1511_s15 = sshll.u32 %s469_s29, 3  ;;  %s2081_s29 = smov 32   ;;  %1574 = vmatprep.mubr.msk.bf16.mxu1 %vm2085_vm1, %v2083_v37  ;;  %vm647_vm2 = vcmask 64512   ;;  %vm899_vm4 = vcmask 1043456   ;;  %vm1103_vm5 = vcmask 130048   ;;  %vm1105_vm6 = vcmask 195584  }
  0x81   : > { %s471_s12 = scalar_lea.vmem %s2491_s0, %s1511_s15  ;;  %590 = vrot.lane.b32.xlu1 %v576_v9, %s2081_s29  ;;  %s2082_s15 = smov 96   ;;  %vm1304_vm7 = vcmask 523264  }
  0x82   : > { %v2301_v0 = vld [vmem:[%s471_s12] sm:$0xff]  ;;  %550 = vmatpush1.bf16.msra.mxu0 %v1778_v8  ;;  %s2087_s12 = smov 104   ;;  %s2089_s22 = smov 64  }
  0x83   : > { %v477_v1 = vsel %vm476_vm0, %v2301_v0, 0.0  ;;  %v482_v2 = vmul.f32 %v2301_v0, %v2301_v0  ;;  %1578 = vmatprep.subr.bf16.mxu0 %v2083_v37  ;;  %s2090_s14 = smov 8   ;;  %s2091_s16 = smov 16  }
  0x84   : > { %478 = vadd.xlane.f32.xlu0 %v477_v1  ;;  %v631_v1 = vshrl.u32 %v630_v63, 7  ;;  %s2092_s26 = smov 24   ;;  %s465_s30 = sand.u32 1, %s2061_s18  }
  0x85   : > { %v483_v3 = vsel %vm476_vm0, %v482_v2, 0.0  ;;  %v633_v2 = vand.u32 127, %v630_v63  ;;  %p2525_p8 = scmp.ne.s32.totalorder %s2510_s27, 0 }
  0x87   : > { %vm634_vm3 = vcmp.le.s32.totalorder %v633_v2, %v631_v1 }
  0x88   : > { %484 = vadd.xlane.f32.xlu0 %v483_v3  ;;  %v2088_v3 = vmov -1e+09  }
  0x89   : > { %v635_v4 = vsel %vm634_vm3, 0.0, %v2088_v3 }
  0x9e   : > { %580 = vrot.lane.b32.xlu0 %v577_v10, %s2082_s15 }
  0xf3   : > { %v591_v33 = vpop.permute.xlu1 %590 }
 0x10d   : > { %v479_v11 = vpop.xlane.xlu0 %478 }
 0x10e   : > { %v481_v12 = vmul.f32 0.03125, %v479_v11 }
 0x110   : > { %v487_v14 = vmul.f32 %v481_v12, %v481_v12  ;;  %v489_v18 = vsub.f32 %v2301_v0, %v481_v12 }
 0x111   : > { %v485_v13 = vpop.xlane.xlu0 %484 }
 0x112   : > { %v486_v15 = vmul.f32 0.03125, %v485_v13 }
 0x114   : > { %v488_v16 = vsub.f32 %v486_v15, %v487_v14 }
 0x115   : > { %v581_v29 = vpop.permute.xlu0 %580 }
 0x116   : > { %v490_v17 = vadd.f32 1e-05, %v488_v16 }
 0x118   : > { %1787 = vrsqrt.f32 %v490_v17 }
 0x125   : > { %v1788_v19 = vpop.eup %1787 }
 0x126   : > { %v492_v21 = vmul.f32 %v1788_v19, %v489_v18 }
 0x128   : > { %v499_v23 = vmul.f32 %v1512_v20, %v492_v21 }
 0x12a   : > { %v506_v24 = vadd.f32 %v1513_v22, %v499_v23 }
 0x12c   : > { %v507_v25 = vpack.c.bf16 %v506_v24, %v506_v24 }
 0x12e   : > { %1518 = vmatmul.mubr.msk.bf16.vlgmr.msra.gmra.mxu0 %vm476_vm0, %v507_v25 }
 0x12f   : > { %1580 = vmatprep.mubr.msk.bf16.mxu0 %vm2085_vm1, %v2083_v37 }
 0x1ee   : > { %v2323_v26 = vpop.f32.mrf.mxu0 }
 0x1ef   : > { %v583_v32 = vmul.f32 %v581_v29, %v2323_v26  ;;  %v593_v34 = vmul.f32 %v591_v33, %v2323_v26  ;;  %v578_v38 = vmul.f32 %v576_v9, %v2323_v26 }
 0x1f0   : > { %v571_v27 = vpop.f32.mrf.mxu0 }
 0x1f1   : > { %v594_v28 = vmul.f32 %v577_v10, %v571_v27 }
 0x1f2   : > { %v573_v30 = vpop.f32.mrf.mxu0 }
 0x1f3   : > { %596 = vrot.lane.b32.xlu1 %v594_v28, %s2081_s29  ;;  %v889_v30 = vpack.c.bf16 %v2323_v26, %v2323_v26 }
 0x1f4   : > { %v574_v31 = vpop.f32.mrf.mxu0 }
 0x1f7   : > { %585 = vrot.lane.b32.xlu1 %v583_v32, %s2081_s29 }
 0x265   : > { %v597_v35 = vpop.permute.xlu1 %596 }
 0x266   : > { %v599_v36 = vadd.f32 %v597_v35, %v593_v34 }
 0x268   : > { %611 = vrot.lane.b32.xlu1 %v599_v36, %s2084_s24  ;;  %v640_v41 = vpack.c.bf16 %v599_v36, %v599_v36 }
 0x269   : > { %v586_v39 = vpop.permute.xlu1 %585 }
 0x26a   : > { %v588_v40 = vadd.f32 %v586_v39, %v578_v38 }
 0x26c   : > { %614 = vrot.lane.b32.xlu1 %v599_v36, %s2086_s13  ;;  %601 = vrot.lane.b32.xlu0 %v588_v40, %s2084_s24  ;;  %v636_v50 = vpack.c.bf16 %v588_v40, %v588_v40 }
 0x270   : > { %617 = vrot.lane.b32.xlu1 %v599_v36, %s2087_s12 }
 0x274   : > { %645 = vrot.lane.b32.xlu1 %v640_v41, %s2082_s15 }
 0x2da   : > { %v612_v42 = vpop.permute.xlu1 %611 }
 0x2db   : > { %v641_v43 = vpack.c.bf16 %v612_v42, %v612_v42 }
 0x2dd   : > { %695 = vrot.lane.b32.xlu1 %v641_v43, %s2082_s15 }
 0x2de   : > { %v615_v44 = vpop.permute.xlu1 %614  ;;  %v602_v53 = vpop.permute.xlu0 %601 }
 0x2df   : > { %v642_v45 = vpack.c.bf16 %v615_v44, %v615_v44  ;;  %v637_v56 = vpack.c.bf16 %v602_v53, %v602_v53 }
 0x2e1   : > { %744 = vrot.lane.b32.xlu1 %v642_v45, %s2082_s15 }
 0x2e2   : > { %v618_v46 = vpop.permute.xlu1 %617 }
 0x2e3   : > { %v643_v47 = vpack.c.bf16 %v618_v46, %v618_v46 }
 0x2e5   : > { %604 = vrot.lane.b32.xlu1 %v588_v40, %s2086_s13  ;;  %793 = vrot.lane.b32.xlu0 %v643_v47, %s2082_s15 }
 0x2e6   : > { %v646_v48 = vpop.permute.xlu1 %645 }
 0x2e7   : > { %v652_v49 = vsel %vm647_vm2, %v646_v48, 0 }
 0x2e8   : > { %1573 = vmatpush3.bf16.xpose.msra.mxu1 %v652_v49 }
 0x2e9   : > { %607 = vrot.lane.b32.xlu0 %v588_v40, %s2087_s12  ;;  %1584 = vmatprep.subr.bf16.mxu1 %v2083_v37 }
 0x2ef   : > { %1575 = vmatmul.mubr.msk.bf16.vlgmr.msra.gmra.mxu1 %vm647_vm2, %v636_v50 }
 0x2f0   : > { %1586 = vmatprep.mubr.msk.bf16.mxu1 %vm2085_vm1, %v2083_v37 }
 0x34f   : > { %v696_v51 = vpop.permute.xlu1 %695 }
 0x350   : > { %v701_v52 = vsel %vm647_vm2, %v696_v51, 0 }
 0x351   : > { %1579 = vmatpush3.bf16.xpose.msra.mxu0 %v701_v52 }
 0x352   : > { %1590 = vmatprep.subr.bf16.mxu0 %v2083_v37 }
 0x353   : > { %v745_v54 = vpop.permute.xlu1 %744 }
 0x354   : > { %v750_v55 = vsel %vm647_vm2, %v745_v54, 0 }
 0x355   : > { %1585 = vmatpush3.bf16.xpose.msra.mxu1 %v750_v55 }
 0x356   : > { %1596 = vmatprep.subr.bf16.mxu1 %v2083_v37 }
 0x357   : > { %v794_v57 = vpop.permute.xlu0 %793  ;;  %v605_v58 = vpop.permute.xlu1 %604 }
 0x358   : > { %v799_v59 = vsel %vm647_vm2, %v794_v57, 0  ;;  %1581 = vmatmul.mubr.msk.bf16.vlgmr.msra.gmra.mxu0 %vm647_vm2, %v637_v56  ;;  %v638_v60 = vpack.c.bf16 %v605_v58, %v605_v58 }
 0x359   : > { %1591 = vmatpush3.bf16.xpose.msra.mxu0 %v799_v59  ;;  %1592 = vmatprep.mubr.msk.bf16.mxu0 %vm2085_vm1, %v2083_v37 }
 0x35a   : > { %1602 = vmatprep.subr.bf16.mxu0 %v2083_v37 }
 0x35b   : > { %v608_v61 = vpop.permute.xlu0 %607 }
 0x35c   : > { %1587 = vmatmul.mubr.msk.bf16.vlgmr.msra.gmra.mxu1 %vm647_vm2, %v638_v60  ;;  %v639_v62 = vpack.c.bf16 %v608_v61, %v608_v61 }
 0x35d   : > { %1598 = vmatprep.mubr.msk.bf16.mxu1 %vm2085_vm1, %v2083_v37 }
 0x360   : > { %1593 = vmatmul.mubr.msk.bf16.vlgmr.msra.gmra.mxu0 %vm647_vm2, %v639_v62 }
 0x361   : > { %1604 = vmatprep.mubr.msk.bf16.mxu0 %vm2085_vm1, %v2083_v37 }
 0x3af   : > { %v688_v5 = vpop.f32.mrf.mxu1 }
 0x3b0   : > { %v689_v6 = vadd.f32 %v688_v5, %v635_v4 }
 0x3b1   : > { %v1576_v7 = vpop.f32.mrf.mxu1 }
 0x3b2   : > { %v841_v8 = vsel %vm647_vm2, %v689_v6, -inf }
 0x3b3   : > { %842 = vmax.xlane.f32.xlu1 %v841_v8  ;;  %v691_v9 = vpop.f32.mrf.mxu1 }
 0x3b5   : > { %v1577_v10 = vpop.f32.mrf.mxu1 }
 0x418   : > { %v737_v11 = vpop.f32.mrf.mxu0 }
 0x419   : > { %v738_v12 = vadd.f32 %v737_v11, %v635_v4 }
 0x41a   : > { %v1582_v13 = vpop.f32.mrf.mxu0 }
 0x41b   : > { %v844_v14 = vsel %vm647_vm2, %v738_v12, -inf }
 0x41c   : > { %845 = vmax.xlane.f32.xlu0 %v844_v14  ;;  %v740_v15 = vpop.f32.mrf.mxu0  ;;  %v786_v16 = vpop.f32.mrf.mxu1 }
 0x41d   : > { %v787_v17 = vadd.f32 %v786_v16, %v635_v4 }
 0x41e   : > { %v1583_v18 = vpop.f32.mrf.mxu0  ;;  %v1588_v19 = vpop.f32.mrf.mxu1 }
 0x41f   : > { %v847_v20 = vsel %vm647_vm2, %v787_v17, -inf }
 0x420   : > { %v835_v21 = vpop.f32.mrf.mxu0  ;;  %848 = vmax.xlane.f32.xlu0 %v847_v20  ;;  %v789_v22 = vpop.f32.mrf.mxu1 }
 0x421   : > { %v836_v23 = vadd.f32 %v835_v21, %v635_v4  ;;  %v1779_v22 = vld [vmem:[%s2497_s6 + $0x8] sm:$0xff]  }
 0x422   : > { %v1589_v24 = vpop.f32.mrf.mxu1  ;;  %v1594_v25 = vpop.f32.mrf.mxu0 }
 0x423   : > { %v850_v27 = vsel %vm647_vm2, %v836_v23, -inf }
 0x424   : > { %851 = vmax.xlane.f32.xlu1 %v850_v27  ;;  %v838_v28 = vpop.f32.mrf.mxu0 }
 0x426   : > { %v1595_v29 = vpop.f32.mrf.mxu0 }
 0x435   : > { %624 = vrot.lane.b32.xlu1 %v2323_v26, %s2086_s13 }
 0x436   : > { %621 = vrot.lane.b32.xlu0 %v2323_v26, %s2084_s24 }
 0x439   : > { %627 = vrot.lane.b32.xlu1 %v2323_v26, %s2087_s12  ;;  %s2093_s12 = smov [#allocation14]  }
 0x43a   : > { %s1997_s19 = sshll.u32 %s2093_s12, 4  ;;  %s1998_s19 = int_to_ptr.vmem [resolvable:$false] %s1997_s19 }
 0x43b   : > { %s1999_s25 = scalar_lea.vmem %s1998_s19, 256 }
 0x43c   : > { %v843_v31 = vpop.xlane.xlu1 %842 }
 0x43d   : > { %v853_v32 = vsub.f32 %v689_v6, %v843_v31  ;;  %894 = vrot.lane.b32.xlu1 %v889_v30, %s2089_s22 }
 0x43f   : > { %v857_v33 = vmul.f32 1.442695, %v853_v32 }
 0x441   : > { %1789 = vpow2.f32 %v857_v33 }
 0x44e   : > { %v1790_v34 = vpop.eup %1789 }
 0x44f   : > { %v865_v35 = vsel %vm647_vm2, %v1790_v34, 0.0 }
 0x455   : > { %866 = vadd.xlane.f32.xlu0 %v865_v35 }
 0x4a5   : > { %v846_v36 = vpop.xlane.xlu0 %845 }
 0x4a6   : > { %v854_v38 = vsub.f32 %v738_v12, %v846_v36 }
 0x4a8   : > { %v859_v39 = vmul.f32 1.442695, %v854_v38 }
 0x4a9   : > { %v849_v40 = vpop.xlane.xlu0 %848 }
 0x4aa   : > { %1791 = vpow2.f32 %v859_v39  ;;  %v855_v41 = vsub.f32 %v787_v17, %v849_v40 }
 0x4ac   : > { %v861_v42 = vmul.f32 1.442695, %v855_v41 }
 0x4ad   : > { %v852_v43 = vpop.xlane.xlu1 %851  ;;  %v622_v57 = vpop.permute.xlu0 %621 }
 0x4ae   : > { %1793 = vpow2.f32 %v861_v42  ;;  %v856_v26 = vsub.f32 %v836_v23, %v852_v43  ;;  %v890_v58 = vpack.c.bf16 %v622_v57, %v622_v57  ;;  %v1780_v23 = vld [vmem:[%s2497_s6] sm:$0xff]  }
 0x4b0   : > { %v863_v44 = vmul.f32 1.442695, %v856_v26 }
 0x4b1   : > { %v625_v45 = vpop.permute.xlu1 %624 }
 0x4b2   : > { %1795 = vpow2.f32 %v863_v44  ;;  %v891_v55 = vpack.c.bf16 %v625_v45, %v625_v45 }
 0x4b5   : > { %v628_v46 = vpop.permute.xlu1 %627 }
 0x4b6   : > { %v892_v56 = vpack.c.bf16 %v628_v46, %v628_v46 }
 0x4b7   : > { %v1792_v47 = vpop.eup %1791 }
 0x4b8   : > { %v868_v48 = vsel %vm647_vm2, %v1792_v47, 0.0 }
 0x4b9   : > { %869 = vadd.xlane.f32.xlu1 %v868_v48  ;;  %v895_v49 = vpop.permute.xlu1 %894 }
 0x4ba   : > { %v901_v50 = vsel %vm899_vm4, %v895_v49, 0 }
 0x4bb   : > { %v1794_v51 = vpop.eup %1793  ;;  %1597 = vmatpush3.bf16.msra.mxu1 %v901_v50 }
 0x4bc   : > { %v871_v52 = vsel %vm647_vm2, %v1794_v51, 0.0  ;;  %1608 = vmatprep.subr.bf16.mxu1 %v2083_v37 }
 0x4bd   : > { %872 = vadd.xlane.f32.xlu0 %v871_v52  ;;  %v1781_v52 = vld [vmem:[#allocation13 + $0x8] sm:$0xff]  }
 0x4bf   : > { %v1796_v53 = vpop.eup %1795 }
 0x4c0   : > { %v874_v54 = vsel %vm647_vm2, %v1796_v53, 0.0 }
 0x4c1   : > { %875 = vadd.xlane.f32.xlu0 %v874_v54 }
 0x4ca   : > { %993 = vrot.lane.b32.xlu1 %v891_v55, %s2089_s22 }
 0x4ce   : > { %1042 = vrot.lane.b32.xlu1 %v892_v56, %s2089_s22 }
 0x4d7   : > { %944 = vrot.lane.b32.xlu0 %v890_v58, %s2089_s22 }
 0x4de   : > { %v867_v59 = vpop.xlane.xlu0 %866 }
 0x4df   : > { %1797 = vrcp.f32 %v867_v59 }
 0x4ec   : > { %v1798_v60 = vpop.eup %1797 }
 0x4ed   : > { %v881_v61 = vmul.f32 %v1798_v60, %v1790_v34 }
 0x4ef   : > { %v885_v62 = vpack.c.bf16 %v881_v61, %v881_v61 }
 0x4f1   : > { %1599 = vmatmul.mubr.msk.bf16.vlgmr.msra.gmra.mxu1 %vm647_vm2, %v885_v62  ;;  %v1530_v62 = vld [vmem:[#allocation10] ss:$0 sm:$0xff] }
 0x4f2   : > { %1610 = vmatprep.mubr.msk.bf16.mxu1 %vm2085_vm1, %v2083_v37 }
 0x542   : > { %v870_v63 = vpop.xlane.xlu1 %869 }
 0x543   : > { %1799 = vrcp.f32 %v870_v63 }
 0x546   : > { %v873_v1 = vpop.xlane.xlu0 %872  ;;  %v994_v2 = vpop.permute.xlu1 %993 }
 0x547   : > { %1801 = vrcp.f32 %v873_v1  ;;  %v999_v3 = vsel %vm899_vm4, %v994_v2, 0  ;;  %v1531_v1 = vld [vmem:[#allocation11] ss:$0 sm:$0xff] }
 0x548   : > { %1609 = vmatpush3.bf16.msra.mxu1 %v999_v3 }
 0x549   : > { %1620 = vmatprep.subr.bf16.mxu1 %v2083_v37 }
 0x54a   : > { %v876_v4 = vpop.xlane.xlu0 %875  ;;  %v1043_v9 = vpop.permute.xlu1 %1042 }
 0x54b   : > { %1803 = vrcp.f32 %v876_v4  ;;  %v1048_v12 = vsel %vm899_vm4, %v1043_v9, 0 }
 0x54e   : > { %v945_v5 = vpop.permute.xlu0 %944 }
 0x54f   : > { %v950_v6 = vsel %vm899_vm4, %v945_v5, 0  ;;  %v1783_v5 = vld [vmem:[%s2501_s10 + $0x18] sm:$0xff]  }
 0x550   : > { %v1800_v7 = vpop.eup %1799  ;;  %1603 = vmatpush3.bf16.msra.mxu0 %v950_v6  ;;  %v1784_v6 = vld [vmem:[%s2501_s10 + $0x10] sm:$0xff]  }
 0x551   : > { %1614 = vmatprep.subr.bf16.mxu0 %v2083_v37  ;;  %v882_v8 = vmul.f32 %v1800_v7, %v1792_v47  ;;  %v1785_v7 = vld [vmem:[%s2501_s10 + $0x8] sm:$0xff]  }
 0x553   : > { %v886_v10 = vpack.c.bf16 %v882_v8, %v882_v8  ;;  %v1786_v8 = vld [vmem:[%s2501_s10] sm:$0xff]  }
 0x554   : > { %v1802_v11 = vpop.eup %1801 }
 0x555   : > { %1605 = vmatmul.mubr.msk.bf16.vlgmr.msra.gmra.mxu0 %vm647_vm2, %v886_v10  ;;  %v883_v13 = vmul.f32 %v1802_v11, %v1794_v51 }
 0x556   : > { %1615 = vmatpush3.bf16.msra.mxu0 %v1048_v12  ;;  %1616 = vmatprep.mubr.msk.bf16.mxu0 %vm2085_vm1, %v2083_v37 }
 0x557   : > { %v887_v14 = vpack.c.bf16 %v883_v13, %v883_v13  ;;  %1628 = vmatprep.subr.bf16.mxu0 %v2083_v37 }
 0x558   : > { %v1804_v15 = vpop.eup %1803 }
 0x559   : > { %1611 = vmatmul.mubr.msk.bf16.vlgmr.msra.gmra.mxu1 %vm647_vm2, %v887_v14  ;;  %v884_v16 = vmul.f32 %v1804_v15, %v1796_v53  ;;  %v1782_v53 = vld [vmem:[#allocation13] sm:$0xff]  }
 0x55a   : > { %1624 = vmatprep.mubr.msk.bf16.mxu1 %vm2085_vm1, %v2083_v37  ;;  %1621 = vmatpush3.bf16.msra.mxu1 %v1779_v22 }
 0x55b   : > { %v888_v17 = vpack.c.bf16 %v884_v16, %v884_v16  ;;  %1622 = vmatprep.subr.bf16.mxu1 %v2083_v37 }
 0x55d   : > { %1617 = vmatmul.mubr.msk.bf16.vlgmr.msra.gmra.mxu0 %vm647_vm2, %v888_v17 }
 0x55e   : > { %1632 = vmatprep.mubr.msk.bf16.mxu0 %vm2085_vm1, %v2083_v37  ;;  %1623 = vmatpush3.bf16.msra.mxu1 %v1780_v23 }
 0x55f   : > { %1636 = vmatprep.subr.bf16.mxu1 %v2083_v37  ;;  %1629 = vmatpush3.bf16.msra.mxu0 %v1781_v52 }
 0x560   : > { %1630 = vmatprep.subr.bf16.mxu0 %v2083_v37 }
 0x563   : > { %1631 = vmatpush3.bf16.msra.mxu0 %v1782_v53 }
 0x5b1   : > { %v937_v18 = vpop.f32.mrf.mxu1 }
 0x5b3   : > { %v1600_v19 = vpop.f32.mrf.mxu1 }
 0x5b5   : > { %v940_v20 = vpop.f32.mrf.mxu1 }
 0x5b7   : > { %v1601_v21 = vpop.f32.mrf.mxu1 }
 0x615   : > { %v986_v24 = vpop.f32.mrf.mxu0 }
 0x616   : > { %1091 = vrot.lane.b32.xlu0 %v986_v24, %s2090_s14  ;;  %s1542_s14 = sshll.u32 %s2175_s21, 7  ;;  %s1351_s21 = scalar_lea.sflag [#allocation4], %s465_s30 }
 0x617   : > { %v1606_v25 = vpop.f32.mrf.mxu0  ;;  %s2449_s24 = scalar_lea.hbm %s2502_s11, %s1542_s14 }
 0x619   : > { %v989_v27 = vpop.f32.mrf.mxu0  ;;  %v1035_v28 = vpop.f32.mrf.mxu1 }
 0x61a   : > { %1095 = vrot.lane.b32.xlu1 %v1035_v28, %s2091_s16 }
 0x61b   : > { %v1607_v29 = vpop.f32.mrf.mxu0  ;;  %v1612_v30 = vpop.f32.mrf.mxu1 }
 0x61d   : > { %v1038_v31 = vpop.f32.mrf.mxu1  ;;  %v1084_v32 = vpop.f32.mrf.mxu0 }
 0x61e   : > { %1099 = vrot.lane.b32.xlu0 %v1084_v32, %s2092_s26 }
 0x61f   : > { %v1613_v33 = vpop.f32.mrf.mxu1  ;;  %v1618_v34 = vpop.f32.mrf.mxu0 }
 0x621   : > { %v1087_v35 = vpop.f32.mrf.mxu0 }
 0x623   : > { %v1619_v36 = vpop.f32.mrf.mxu0 }
 0x688   : > { %v1092_v38 = vpop.permute.xlu0 %1091 }
 0x689   : > { %v1102_v40 = vsel %vm647_vm2, %v937_v18, %v1092_v38 }
 0x68c   : > { %v1096_v39 = vpop.permute.xlu1 %1095 }
 0x68d   : > { %v1104_v41 = vsel %vm1103_vm5, %v1102_v40, %v1096_v39 }
 0x690   : > { %v1100_v42 = vpop.permute.xlu0 %1099 }
 0x691   : > { %v1106_v43 = vsel %vm1105_vm6, %v1104_v41, %v1100_v42 }
 0x692   : > { %v1107_v26 = vpack.c.bf16 %v1106_v43, %v1106_v43 }
 0x694   : > { %1625 = vmatmul.mubr.msk.bf16.vlgmr.msra.gmra.mxu1 %vm476_vm0, %v1107_v26 }
 0x695   : > { %1644 = vmatprep.mubr.msk.bf16.mxu1 %vm2085_vm1, %v2083_v37  ;;  %1637 = vmatpush3.bf16.msra.mxu1 %v1783_v5 }
 0x696   : > { %1638 = vmatprep.subr.bf16.mxu1 %v2083_v37 }
 0x699   : > { %1639 = vmatpush3.bf16.msra.mxu1 %v1784_v6 }
 0x69a   : > { %1640 = vmatprep.subr.bf16.mxu1 %v2083_v37 }
 0x69d   : > { %1641 = vmatpush3.bf16.msra.mxu1 %v1785_v7 }
 0x69e   : > { %1642 = vmatprep.subr.bf16.mxu1 %v2083_v37 }
 0x6a1   : > { %1643 = vmatpush3.bf16.msra.mxu1 %v1786_v8 }
 0x754   : > { %v1161_v44 = vpop.f32.mrf.mxu1 }
 0x755   : > { %v2417_v45 = vadd.f32 %v1161_v44, %v2301_v0 }
 0x756   : > { %v1626_v46 = vpop.f32.mrf.mxu1 }
 0x757   : > { %v1170_v47 = vsel %vm476_vm0, %v2417_v45, 0.0  ;;  %v1174_v48 = vmul.f32 %v2417_v45, %v2417_v45 }
 0x758   : > { %1171 = vadd.xlane.f32.xlu1 %v1170_v47  ;;  %v1164_v49 = vpop.f32.mrf.mxu1 }
 0x759   : > { %v1175_v50 = vsel %vm476_vm0, %v1174_v48, 0.0 }
 0x75a   : > { %1176 = vadd.xlane.f32.xlu0 %v1175_v50  ;;  %v1627_v51 = vpop.f32.mrf.mxu1 }
 0x7e1   : > { %v1172_v0 = vpop.xlane.xlu1 %1171 }
 0x7e2   : > { %v1173_v54 = vmul.f32 0.03125, %v1172_v0 }
 0x7e3   : > { %v1177_v55 = vpop.xlane.xlu0 %1176 }
 0x7e4   : > { %v1179_v56 = vmul.f32 %v1173_v54, %v1173_v54  ;;  %v1178_v57 = vmul.f32 0.03125, %v1177_v55  ;;  %v1181_v60 = vsub.f32 %v2417_v45, %v1173_v54 }
 0x7e6   : > { %v1180_v58 = vsub.f32 %v1178_v57, %v1179_v56 }
 0x7e8   : > { %v1182_v59 = vadd.f32 1e-05, %v1180_v58 }
 0x7ea   : > { %1805 = vrsqrt.f32 %v1182_v59 }
 0x7f7   : > { %v1806_v61 = vpop.eup %1805 }
 0x7f8   : > { %v1184_v63 = vmul.f32 %v1806_v61, %v1181_v60 }
 0x7fa   : > { %v1191_v2 = vmul.f32 %v1530_v62, %v1184_v63 }
 0x7fc   : > { %v1198_v3 = vadd.f32 %v1531_v1, %v1191_v2 }
 0x7fe   : > { %v1199_v4 = vpack.c.bf16 %v1198_v3, %v1198_v3 }
 0x800   : > { %1633 = vmatmul.mubr.msk.bf16.vlgmr.msra.gmra.mxu0 %vm476_vm0, %v1199_v4 }
 0x8c0   : > { %v1253_v9 = vpop.f32.mrf.mxu0 }
 0x8c1   : > { %1267 = vrot.lane.b32.xlu0 %v1253_v9, %s2089_s22  ;;  %v1535_v13 = vmul.f32 -1.442695, %v1253_v9  ;;  %s1510_s22 = sshll.u32 %s465_s30, 3 }
 0x8c2   : > { %v1634_v10 = vpop.f32.mrf.mxu0  ;;  %s467_s16 = scalar_lea.vmem [#allocation14], %s1510_s22 }
 0x8c3   : > { %1807 = vpow2.f32 %v1535_v13  ;;  %s1364_s26 = sshll.u32 %s467_s16, 4  ;;  %s2451_s26 = int_to_ptr.vmem [resolvable:$true] %s1364_s26 }
 0x8c4   : > { %v1256_v11 = vpop.f32.mrf.mxu0  ;;  %s1993_s13 = scalar_lea.vmem %s2451_s26, 128  ;;  %p2000_p1 = scmp.lt.s32.totalorder %s2451_s26, %s1998_s19 }
 0x8c5   : > { %p1994_p7 = scmp.ne.s32.totalorder %s2451_s26, %s1993_s13  ;;  %p2001_p2 = scmp.lt.s32.totalorder %s1999_s25, %s1993_s13 }
 0x8c6   : > { %v1635_v12 = vpop.f32.mrf.mxu0 }
 0x8c7   : > { %p1995_p11 = pnand %p1994_p7, %p2525_p8  ;;  %p2002_p13 = por %p2001_p2, %p2000_p1 }
 0x8c9   : > { %p1996_p0 = pneg %p1995_p11 }
 0x8cb   : > { %p2003_p9 = pnand %p2002_p13, %p1996_p0 }
 0x8d0   : > { %v1808_v14 = vpop.eup %1807 }
 0x8d1   : > { %v1262_v15 = vadd.f32 1.0, %v1808_v14 }
 0x8d3   : > { %1809 = vrcp.f32 %v1262_v15 }
 0x8e0   : > { %v1810_v16 = vpop.eup %1809 }
 0x8e1   : > { %v1265_v37 = vmul.f32 %v1810_v16, %v1253_v9 }
 0x933   : > { %v1268_v17 = vpop.permute.xlu0 %1267 }
 0x934   : > { %v1270_v18 = vmul.f32 %v1268_v17, %v1265_v37 }
 0x936   : > { %v1271_v19 = vpack.c.bf16 %v1270_v18, %v1270_v18 }
 0x938   : > { %1645 = vmatmul.mubr.msk.bf16.vlgmr.msra.gmra.mxu1 %vm1304_vm7, %v1271_v19 }
 0x9f8   : > { %v1342_v20 = vpop.f32.mrf.mxu1 }
 0x9f9   : > { %v1348_v21 = vadd.f32 %v1342_v20, %v2417_v45 }
 0x9fa   : > { %v1646_v22 = vpop.f32.mrf.mxu1 }
 0x9fb   : > { %1349 = vst.msk [vmem:[%s467_s16] sm:$0xff] %vm476_vm0, %v1348_v21 }
 0x9fc   : > { %v1345_v23 = vpop.f32.mrf.mxu1 }
 0x9fd   : > { %2006 = shalt.err (!%p2003_p9)
}
 0x9fe   : > { %s2007_s2 = scalar_lea.hbm %s2449_s24, 128  ;;  %s2011_s14 = scalar_lea.hbm %s2502_s11, 256 }
 0x9ff   : > { %p2008_p3 = scmp.ne.s32.totalorder %s2449_s24, %s2007_s2  ;;  %p2012_p6 = scmp.lt.s32.totalorder %s2449_s24, %s2502_s11 }
 0xa00   : > { %p2013_p10 = scmp.lt.s32.totalorder %s2011_s14, %s2007_s2 }
 0xa01   : > { %p2009_p5 = pnand %p2008_p3, %p2525_p8 }
 0xa02   : > { %p2014_p4 = por %p2013_p10, %p2012_p6 }
 0xa03   : > { %p2010_p12 = pneg %p2009_p5 }
 0xa05   : > { %p2015_p7 = pnand %p2014_p4, %p2010_p12 }
 0xa07   : > { %2018 = shalt.err (!%p2015_p7)
}
 0xa08   : > { %1676 = dma.vmem_to_hbm [thread:$0]  (%p2525_p8), %s2451_s26, 128, %s2449_s24, %s1351_s21   ;;  %v1647_v24 = vpop.f32.mrf.mxu1 }
 0xa09 PF: > { %p1718_p11 = scmp.ge.s32.totalorder %s2069_s20, 2  ;;  %s1376_s15 = sand.u32 1, %s2057_s17  }
 0xa0a   : > { %p2526_p0 = scmp.ne.s32.totalorder %s2511_s28, 0  ;;  %s1377_s13 = scalar_lea.sflag [#allocation4], %s1376_s15 }
 0xa0c   : > { %p1701_p1 = pnand %p1718_p11, %p2526_p0 }
 0xa0e   : > { %p1702_p2 = pneg %p1701_p1 }
 0xa10   : > { %2052 = dma.done.wait (%p1702_p2), %s1377_s13, 128  }
 0xa11   : > { %2054 = vsyncadd (%p1702_p2), %s1377_s13, 4294967168  ;;  %s2527_s12 = sld [smem:[#allocation20_spill]]  ;;  %p25_p13 = scmp.ge.s32.totalorder %s2179_s23, 4  }
 0xa12   : > { %s2528_s19 = sld [smem:[#allocation21_spill]]  ;;  %s2529_s17 = smov %s2061_s18 }
 0xa13   : > { %s2531_s20 = smov %s2179_s23  ;;  %27 = sbr.rel (!%p25_p13) target bundleno = 9 (0x9), region = 128 }
 0xa17   : > { %s2530_s18 = smov %s2527_s12 }
 0xa18   :  { %1382 = vsyncpa [#allocation3], 1 }
 0xa19   :  { %1384 = vsyncpa [#allocation3 + $0x1], 1 }
 0xa1a   :  { %1385 = vsyncpa [#allocation6], 1 }
 0xa1b   :  { %1386 = vsyncpa [#allocation9], 1 }
 0xa1c   :  { %1387 = vsyncpa [#allocation12], 1 }
 0xa1d   :  { %1388 = vsyncpa [#allocation4], 1 }
 0xa1e   :  { %1390 = vsyncpa [#allocation4 + $0x1], 1 }

</bundles_post_ra>
